<compile_context>
chip_gen: v6e
topology: v6e:2x2x1
jax: 0.10.0
libtpu: 0.0.40
codegen_flags: <defaults>
</compile_context>

<pallas_src>
import functools

import jax
import jax.numpy as jnp
from jax.experimental import pallas as pl
from jax.experimental.pallas import tpu as pltpu


# ---------------------------------------------------------------------------
# Fused kernel
# ---------------------------------------------------------------------------

def _line_fused_kernel(x_ref, w12_ref, b12_ref, w3_ref, b3_ref,
                       o1_ref, o2_ref, h_ref, *, e1):
    n = pl.program_id(0)

    # ---- Stage 1 (runs once, on the first grid step) -----------------------
    # [order1 | hidden] = x @ [W1.T | W2.T] + [b1 | b2]   (single 128-wide GEMM)
    @pl.when(n == 0)
    def _():
        fused = jnp.dot(x_ref[...], w12_ref[...],
                        preferred_element_type=jnp.float32) + b12_ref[...]
        o1_ref[...] = fused[:, :e1].astype(o1_ref.dtype)   # order1, written once
        h_ref[...] = fused[:, e1:].astype(h_ref.dtype)     # bf16 hidden, VMEM-resident

    # ---- Stage 2 (every grid step: one output-D tile of order2) ------------
    o2 = jnp.dot(h_ref[...], w3_ref[...], preferred_element_type=jnp.float32)
    o2_ref[...] = (o2 + b3_ref[...]).astype(o2_ref.dtype)


# ---------------------------------------------------------------------------
# Wrapper
# ---------------------------------------------------------------------------

def _pick_tile(dim, cap=8192):
    """Largest multiple of 128 dividing `dim`, capped at `cap`."""
    if dim % 128 != 0:
        # Full-extent block is always legal; fine for moderate D.
        return dim
    t = min(dim, cap)
    t -= t % 128
    while dim % t != 0:
        t -= 128
    return t


def line_forward(x, params, *, tn=None):
    """params: dict from init_line_params (fused, pre-transposed weights)."""
    B, D = x.shape
    w12 = params["w12"]          # (D, E1+E2)
    b12 = params["b12"]          # (1, E1+E2), f32
    w3 = params["w3"]            # (E2, D)
    b3 = params["b3"]            # (1, D),     f32
    E1, E2 = params["e1"], params["e2"]
    E12 = E1 + E2

    # Cast activations to the weight dtype for the MXU; f32 accumulation inside.
    xc = x.astype(w12.dtype)

    # Large output-D tiles to amortize per-grid-step overhead (~0.35 µs/step).
    tn = tn or _pick_tile(D, 8192)
    if D % tn != 0:
        raise ValueError(f"tn={tn} must divide D={D}")
    if tn != D and tn % 128 != 0:
        raise ValueError(f"tn={tn} must be a multiple of 128 (or equal D)")
    N = D // tn

    isz = lambda a: jnp.dtype(a.dtype).itemsize

    # Rough VMEM footprint (double-buffered blocks + hidden scratch), with
    # headroom.  Floor keeps us at the platform defaults; cap stays below
    # v7x's 64 MiB physical VMEM.
    vmem_est = 2 * (xc.size * isz(xc) + w12.size * isz(w12) + b12.size * 4
                    + E2 * tn * isz(w3) + tn * 4
                    + B * E1 * isz(x) + B * tn * isz(x)) + B * E2 * 2
    vmem_limit = int(min(max(2 * vmem_est, 8 << 20), 56 << 20))

    kernel = functools.partial(_line_fused_kernel, e1=E1)

    o1, o2 = pl.pallas_call(
        kernel,
        out_shape=(jax.ShapeDtypeStruct((B, E1), x.dtype),
                   jax.ShapeDtypeStruct((B, D), x.dtype)),
        grid=(N,),
        in_specs=[
            pl.BlockSpec((B, D), lambda n: (0, 0)),       # x       (resident, DMA'd once)
            pl.BlockSpec((D, E12), lambda n: (0, 0)),     # W12     (resident, DMA'd once)
            pl.BlockSpec((1, E12), lambda n: (0, 0)),     # b12
            pl.BlockSpec((E2, tn), lambda n: (0, n)),     # W3      (streamed tiles)
            pl.BlockSpec((1, tn), lambda n: (0, n)),      # b3      (streamed tiles)
        ],
        out_specs=(
            pl.BlockSpec((B, E1), lambda n: (0, 0)),      # order1  (written at n==0)
            pl.BlockSpec((B, tn), lambda n: (0, n)),      # order2  (lane-dense tiles)
        ),
        scratch_shapes=[pltpu.VMEM((B, E2), w3.dtype)],   # hidden, persists across grid
        compiler_params=pltpu.CompilerParams(
            # Sequential: every stage-2 tile depends on the hidden from n==0.
            dimension_semantics=("arbitrary",),
            vmem_limit_bytes=vmem_limit),
        cost_estimate=pl.CostEstimate(
            flops=2 * B * D * E12 + 2 * B * E2 * D,
            transcendentals=0,
            bytes_accessed=(xc.size * isz(xc) + w12.size * isz(w12)
                            + b12.size * 4 + w3.size * isz(w3) + b3.size * 4
                            + B * E1 * isz(x) + B * D * isz(x))),
    )(xc, w12, b12, w3, b3)

    return o1, o2


# ---------------------------------------------------------------------------
# Params (PyTorch-style init, stored fused / pre-transposed)
# ---------------------------------------------------------------------------

def init_line_params(key, data_size, embedding_size=128,
                     weight_dtype=jnp.bfloat16):
    e1 = embedding_size // 2
    e2 = (embedding_size + embedding_size % 2) // 2
    ks = jax.random.split(key, 6)

    def lin(kw, kb, fan_in, fan_out):
        bound = 1.0 / (fan_in ** 0.5)
        w = jax.random.uniform(kw, (fan_out, fan_in), jnp.float32, -bound, bound)
        b = jax.random.uniform(kb, (fan_out,), jnp.float32, -bound, bound)
        return w, b

    w1, b1 = lin(ks[0], ks[1], data_size, e1)
    w2, b2 = lin(ks[2], ks[3], data_size, e2)
    w3, b3 = lin(ks[4], ks[5], e2, data_size)

    # Pre-transpose to (in, out) once, fuse stage-1 weights, cast once.
    w12 = jnp.concatenate([w1.T, w2.T], axis=1).astype(weight_dtype)   # (D, e1+e2)
    b12 = jnp.concatenate([b1, b2])[None, :].astype(jnp.float32)       # (1, e1+e2)
    return {
        "w12": w12, "b12": b12,
        "w3": w3.T.astype(weight_dtype),          # (e2, D)
        "b3": b3[None, :].astype(jnp.float32),    # (1, D)
        "e1": e1, "e2": e2,
    }


# ---------------------------------------------------------------------------
# Demo / correctness check
# ---------------------------------------------------------------------------

if __name__ == "__main__":
    key = jax.random.PRNGKey(0)
    k_x, k_p = jax.random.split(key)

    B, DATA_SIZE, EMB = 8, 256, 128
    x = jax.random.normal(k_x, (B, DATA_SIZE), jnp.float32)
    params = init_line_params(k_p, DATA_SIZE, EMB)

    # Run once with the default (single-tile) grid and once with tn=128 so the
    # multi-tile (N=2) path and the pl.when(n==0) gating are both exercised.
    order1, order2 = line_forward(x, params)
    order1_t, order2_t = line_forward(x, params, tn=128)
    jax.block_until_ready((order1, order2, order1_t, order2_t))

    # Reference mirroring the kernel's numerics (bf16 operands, f32 accumulation).
    E1 = params["e1"]
    xb = x.astype(jnp.bfloat16)
    fused_ref = jnp.dot(xb, params["w12"],
                        preferred_element_type=jnp.float32) + params["b12"]
    ref1 = fused_ref[:, :E1]
    h_ref = fused_ref[:, E1:].astype(jnp.bfloat16)
    ref2 = jnp.dot(h_ref, params["w3"],
                   preferred_element_type=jnp.float32) + params["b3"]

    assert order1.shape == (B, EMB // 2) and order2.shape == (B, DATA_SIZE)
    assert jnp.allclose(order1, ref1, atol=1e-2, rtol=1e-2)
    assert jnp.allclose(order2, ref2, atol=1e-2, rtol=1e-2)
    assert jnp.allclose(order1_t, ref1, atol=1e-2, rtol=1e-2)
    assert jnp.allclose(order2_t, ref2, atol=1e-2, rtol=1e-2)

    print("KERNEL_OK")
</pallas_src>

<mosaic_0001>
module attributes {stable_mosaic.version = 11 : i64} {
  func.func @_line_fused_kernel(%arg0: i32, %arg1: memref<8x256xbf16, #tpu.memory_space<vmem>>, %arg2: memref<256x128xbf16, #tpu.memory_space<vmem>>, %arg3: memref<1x128xf32, #tpu.memory_space<vmem>>, %arg4: memref<64x256xbf16, #tpu.memory_space<vmem>>, %arg5: memref<1x256xf32, #tpu.memory_space<vmem>>, %arg6: memref<8x64xf32, #tpu.memory_space<vmem>>, %arg7: memref<8x256xf32, #tpu.memory_space<vmem>>, %arg8: memref<8x64xbf16, #tpu.memory_space<vmem>>) attributes {dimension_semantics = [#tpu.dimension_semantics<arbitrary>], iteration_bounds = array<i64: 1>, scalar_prefetch = 0 : i64, scratch_operands = 1 : i64, tpu.core_type = #tpu.core_type<tc>, window_params = [{pipeline_mode = #tpu.pipeline_mode<synchronous>, transform_indices = @transform_0, window_bounds = array<i64: 8, 256>}, {pipeline_mode = #tpu.pipeline_mode<synchronous>, transform_indices = @transform_1, window_bounds = array<i64: 256, 128>}, {pipeline_mode = #tpu.pipeline_mode<synchronous>, transform_indices = @transform_2, window_bounds = array<i64: 1, 128>}, {transform_indices = @transform_3, window_bounds = array<i64: 64, 256>}, {transform_indices = @transform_4, window_bounds = array<i64: 1, 256>}, {pipeline_mode = #tpu.pipeline_mode<synchronous>, transform_indices = @transform_5, window_bounds = array<i64: 8, 64>}, {transform_indices = @transform_6, window_bounds = array<i64: 8, 256>}]} {
    %c0_i32 = arith.constant 0 : i32
    %0 = arith.cmpi eq, %arg0, %c0_i32 : i32
    %1 = arith.extui %0 : i1 to i32
    %c0_i32_0 = arith.constant 0 : i32
    %2 = arith.cmpi ne, %1, %c0_i32_0 : i32
    scf.if %2 {
      %c0_8 = arith.constant 0 : index
      %c0_9 = arith.constant 0 : index
      %10 = vector.load %arg1[%c0_8, %c0_9] : memref<8x256xbf16, #tpu.memory_space<vmem>>, vector<8x256xbf16>
      %c0_10 = arith.constant 0 : index
      %c0_11 = arith.constant 0 : index
      %11 = vector.load %arg2[%c0_10, %c0_11] : memref<256x128xbf16, #tpu.memory_space<vmem>>, vector<256x128xbf16>
      %cst_12 = arith.constant dense<0.000000e+00> : vector<8x128xf32>
      %12 = tpu.matmul %10, %11, %cst_12 {dimension_numbers = #tpu.dot_dimension_numbers<[1], [0], [0], [1], [0, 0, 1, 1], [], []>} : vector<8x256xbf16>, vector<256x128xbf16>, vector<8x128xf32> -> vector<8x128xf32>
      %c0_13 = arith.constant 0 : index
      %c0_14 = arith.constant 0 : index
      %13 = vector.load %arg3[%c0_13, %c0_14] : memref<1x128xf32, #tpu.memory_space<vmem>>, vector<1x128xf32>
      %14 = vector.broadcast %13 : vector<1x128xf32> to vector<8x128xf32>
      %15 = arith.addf %12, %14 : vector<8x128xf32>
      %16 = vector.extract_strided_slice %15 {offsets = [0, 0], sizes = [8, 64], strides = [1, 1]} : vector<8x128xf32> to vector<8x64xf32>
      %c0_15 = arith.constant 0 : index
      %c0_16 = arith.constant 0 : index
      %17 = vector.load %arg6[%c0_15, %c0_16] : memref<8x64xf32, #tpu.memory_space<vmem>>, vector<8x64xf32>
      tpu.vector_store %arg6[%c0_15, %c0_16], %16 {strides = array<i32>} : memref<8x64xf32, #tpu.memory_space<vmem>>, vector<8x64xf32>,
      %18 = vector.extract_strided_slice %15 {offsets = [0, 64], sizes = [8, 64], strides = [1, 1]} : vector<8x128xf32> to vector<8x64xf32>
      %19 = arith.truncf %18 : vector<8x64xf32> to vector<8x64xbf16>
      %c0_17 = arith.constant 0 : index
      %c0_18 = arith.constant 0 : index
      %20 = vector.load %arg8[%c0_17, %c0_18] : memref<8x64xbf16, #tpu.memory_space<vmem>>, vector<8x64xbf16>
      tpu.vector_store %arg8[%c0_17, %c0_18], %19 {strides = array<i32>} : memref<8x64xbf16, #tpu.memory_space<vmem>>, vector<8x64xbf16>,
    } else {
    }
    %c0 = arith.constant 0 : index
    %c0_1 = arith.constant 0 : index
    %3 = vector.load %arg8[%c0, %c0_1] : memref<8x64xbf16, #tpu.memory_space<vmem>>, vector<8x64xbf16>
    %c0_2 = arith.constant 0 : index
    %c0_3 = arith.constant 0 : index
    %4 = vector.load %arg4[%c0_2, %c0_3] : memref<64x256xbf16, #tpu.memory_space<vmem>>, vector<64x256xbf16>
    %cst = arith.constant dense<0.000000e+00> : vector<8x256xf32>
    %5 = tpu.matmul %3, %4, %cst {dimension_numbers = #tpu.dot_dimension_numbers<[1], [0], [0], [1], [0, 0, 1, 1], [], []>} : vector<8x64xbf16>, vector<64x256xbf16>, vector<8x256xf32> -> vector<8x256xf32>
    %c0_4 = arith.constant 0 : index
    %c0_5 = arith.constant 0 : index
    %6 = vector.load %arg5[%c0_4, %c0_5] : memref<1x256xf32, #tpu.memory_space<vmem>>, vector<1x256xf32>
    %7 = vector.broadcast %6 : vector<1x256xf32> to vector<8x256xf32>
    %8 = arith.addf %5, %7 : vector<8x256xf32>
    %c0_6 = arith.constant 0 : index
    %c0_7 = arith.constant 0 : index
    %9 = vector.load %arg7[%c0_6, %c0_7] : memref<8x256xf32, #tpu.memory_space<vmem>>, vector<8x256xf32>
    tpu.vector_store %arg7[%c0_6, %c0_7], %8 {strides = array<i32>} : memref<8x256xf32, #tpu.memory_space<vmem>>, vector<8x256xf32>,
    return
  }
  func.func @transform_0(%arg0: i32) -> (i32, i32) {
    %c0_i32 = arith.constant 0 : i32
    %c0_i32_0 = arith.constant 0 : i32
    %c0_i32_1 = arith.constant 0 : i32
    return %c0_i32, %c0_i32_0 : i32, i32
  }
  func.func @transform_1(%arg0: i32) -> (i32, i32) {
    %c0_i32 = arith.constant 0 : i32
    %c0_i32_0 = arith.constant 0 : i32
    %c0_i32_1 = arith.constant 0 : i32
    return %c0_i32, %c0_i32_0 : i32, i32
  }
  func.func @transform_2(%arg0: i32) -> (i32, i32) {
    %c0_i32 = arith.constant 0 : i32
    %c0_i32_0 = arith.constant 0 : i32
    %c0_i32_1 = arith.constant 0 : i32
    return %c0_i32, %c0_i32_0 : i32, i32
  }
  func.func @transform_3(%arg0: i32) -> (i32, i32) {
    %c0_i32 = arith.constant 0 : i32
    %c0_i32_0 = arith.constant 0 : i32
    return %c0_i32, %arg0 : i32, i32
  }
  func.func @transform_4(%arg0: i32) -> (i32, i32) {
    %c0_i32 = arith.constant 0 : i32
    %c0_i32_0 = arith.constant 0 : i32
    return %c0_i32, %arg0 : i32, i32
  }
  func.func @transform_5(%arg0: i32) -> (i32, i32) {
    %c0_i32 = arith.constant 0 : i32
    %c0_i32_0 = arith.constant 0 : i32
    %c0_i32_1 = arith.constant 0 : i32
    return %c0_i32, %c0_i32_0 : i32, i32
  }
  func.func @transform_6(%arg0: i32) -> (i32, i32) {
    %c0_i32 = arith.constant 0 : i32
    %c0_i32_0 = arith.constant 0 : i32
    return %c0_i32, %arg0 : i32, i32
  }
}

</mosaic_0001>

<bundles_post_ra>
// kernel: tpu_custom_call.1
= control target key start
LH: loop header
LB: loop body
LE: loop exit
PB: predicated region body
PF: predicated region fallthrough
CT: control target
= control target key end

     0   :  { %12 = vsyncpa [#allocation4], 0  ;;  %s669_s0 = inlined_call_operand.hbm [shape: bf16[8,256], index: 0, kind: input, shape index: {}]   ;;  %s670_s1 = inlined_call_operand.hbm [shape: bf16[256,128], index: 1, kind: input, shape index: {}]   ;;  %s671_s2 = inlined_call_operand.vmem [shape: f32[1,128], index: 2, kind: input, shape index: {}]   ;;  %s672_s3 = inlined_call_operand.hbm [shape: bf16[64,256], index: 3, kind: input, shape index: {}]   ;;  %s673_s4 = inlined_call_operand.vmem [shape: f32[1,256], index: 4, kind: input, shape index: {}]   ;;  %s674_s5 = inlined_call_operand.hbm [shape: f32[8,64], index: 5, kind: output, shape index: {0}]   ;;  %s675_s6 = inlined_call_operand.hbm [shape: f32[8,256], index: 6, kind: output, shape index: {1}]  }
   0x1   :  { %13 = vsyncpa [#allocation7], 0 }
   0x2   :  { %14 = vsyncpa [#allocation5], 0 }
   0x3   :  { %15 = vsyncpa [#allocation11], 0  ;;  %s600_s21 = smov [#allocation6]  }
   0x4   :  { %s31_s22 = sshll.u32 %s600_s21, 4  ;;  %s32_s22 = int_to_ptr.vmem [resolvable:$true] %s31_s22 }
   0x5   :  { %s500_s23 = scalar_lea.vmem %s32_s22, 2048  ;;  %p505_p1 = scmp.lt.s32.totalorder %s32_s22, %s32_s22 }
   0x6   :  { %p501_p0 = scmp.ne.s32.totalorder %s32_s22, %s500_s23  ;;  %p506_p2 = scmp.lt.s32.totalorder %s500_s23, %s500_s23 }
   0x8   :  { %p507_p3 = por %p506_p2, %p505_p1 }
   0xa   :  { %p508_p4 = pnand %p507_p3, %p501_p0 }
   0xc   :  { %511 = shalt.err (!%p508_p4)
}
   0xd   :  { %s601_s24 = smov 64   ;;  %s602_s25 = smov 4  }
   0xe   :  { %37 = dma.hbm_to_vmem [thread:$0]  %s670_s1, 2048, %s32_s22, [#allocation7], %s601_s24, %s601_s24, %s602_s25  }
   0xf   :  { %s603_s28 = smov [#allocation3]   ;;  %s604_s30 = smov [#allocation8]  }
  0x10   :  { %s22_s29 = sshll.u32 %s603_s28, 4  ;;  %s45_s7 = sshll.u32 %s604_s30, 4  ;;  %s23_s29 = int_to_ptr.vmem [resolvable:$true] %s22_s29  ;;  %s46_s7 = int_to_ptr.vmem [resolvable:$true] %s45_s7 }
  0x11   :  { %s520_s8 = scalar_lea.vmem %s23_s29, 128  ;;  %p525_p6 = scmp.lt.s32.totalorder %s23_s29, %s23_s29 }
  0x12   :  { %p521_p5 = scmp.ne.s32.totalorder %s23_s29, %s520_s8  ;;  %p526_p7 = scmp.lt.s32.totalorder %s520_s8, %s520_s8 }
  0x14   :  { %p527_p8 = por %p526_p7, %p525_p6 }
  0x16   :  { %p528_p9 = pnand %p527_p8, %p521_p5 }
  0x18   :  { %531 = shalt.err (!%p528_p9)
}
  0x19   :  { %25 = dma.hbm_to_vmem [thread:$0]  %s669_s0, 128, %s23_s29, [#allocation4]  }
  0x1a   :  { %s540_s11 = scalar_lea.vmem %s46_s7, 1024  ;;  %p545_p11 = scmp.lt.s32.totalorder %s46_s7, %s46_s7 }
  0x1b   :  { %p541_p10 = scmp.ne.s32.totalorder %s46_s7, %s540_s11  ;;  %p546_p12 = scmp.lt.s32.totalorder %s540_s11, %s540_s11 }
  0x1d   :  { %p547_p13 = por %p546_p12, %p545_p11 }
  0x1f   :  { %p548_p0 = pnand %p547_p13, %p541_p10 }
  0x21   :  { %551 = shalt.err (!%p548_p0)
}
  0x22   :  { %s605_s1 = smov 128   ;;  %s606_s12 = smov 8  }
  0x23   :  { %51 = dma.hbm_to_vmem [thread:$0]  %s672_s3, 1024, %s46_s7, [#allocation7], %s605_s1, %s605_s1, %s606_s12  }
  0x24   :  { %592 = dma.done.wait [#allocation4], 128  }
  0x25   :  { %593 = vsyncadd [#allocation4], 4294967168 }
  0x26   :  { %594 = dma.done.wait [#allocation7], 3072  }
  0x27   :  { %595 = vsyncadd [#allocation7], 4294964224  ;;  %v462_v0 = vld [vmem:[#allocation6 + $0x78] sm:$0xff]   ;;  %v464_v2 = vld [vmem:[#allocation6 + $0x70] sm:$0xff]   ;;  %v607_v27 = vmov 0   ;;  %vm251_vm0 = vcmask 523264  }
  0x28   :  { %v463_v1 = vld [vmem:[#allocation6 + $0x38] sm:$0xff]   ;;  %430 = vmatprep.subr.bf16.mxu0 %v462_v0  ;;  %v465_v3 = vld [vmem:[#allocation6 + $0x30] sm:$0xff]   ;;  %v466_v4 = vld [vmem:[#allocation6 + $0x68] sm:$0xff]   ;;  %359 = vmatprep.mubr.bf16.mxu1 %v607_v27  ;;  %vm260_vm1 = vcmask 519168   ;;  %s608_s15 = smov [#allocation9]  }
  0x29   :  { %431 = vmatpush3.bf16.msra.mxu0 %v463_v1  ;;  %v467_v5 = vld [vmem:[#allocation6 + $0x28] sm:$0xff]   ;;  %v468_v6 = vld [vmem:[#allocation6 + $0x60] sm:$0xff]   ;;  %v470_v8 = vld [vmem:[#allocation6 + $0x58] sm:$0xff]   ;;  %s376_s16 = sshll.u32 %s608_s15, 4  ;;  %s377_s16 = int_to_ptr.vmem [resolvable:$true] %s376_s16 }
  0x2a   :  { %432 = vmatprep.subr.bf16.mxu0 %v464_v2  ;;  %v469_v7 = vld [vmem:[#allocation6 + $0x20] sm:$0xff]   ;;  %v471_v9 = vld [vmem:[#allocation6 + $0x18] sm:$0xff]   ;;  %v472_v10 = vld [vmem:[#allocation6 + $0x50] sm:$0xff]   ;;  %s552_s17 = scalar_lea.vmem %s377_s16, 128  ;;  %p557_p2 = scmp.lt.s32.totalorder %s377_s16, %s377_s16 }
  0x2b   :  { %v68_v11 = vld [vmem:[#allocation3] sm:$0xff]  ;;  %v473_v13 = vld [vmem:[#allocation6 + $0x10] sm:$0xff]   ;;  %v474_v14 = vld [vmem:[#allocation6 + $0x48] sm:$0xff]   ;;  %p553_p1 = scmp.ne.s32.totalorder %s377_s16, %s552_s17  ;;  %p558_p3 = scmp.lt.s32.totalorder %s552_s17, %s552_s17 }
  0x2c   :  { %v402_v12 = vcombine.high %v68_v11, %v68_v11  ;;  %v475_v15 = vld [vmem:[#allocation6 + $0x8] sm:$0xff]   ;;  %v476_v16 = vld [vmem:[#allocation6 + $0x40] sm:$0xff]   ;;  %v401_v18 = vcombine.low %v68_v11, %v68_v11  ;;  %v480_v19 = vld [vmem:[#allocation8 + $0x34] ss:$8 sps:$4 sm:$0xff]  }
  0x2d   :  { %433 = vmatpush3.bf16.msra.mxu0 %v465_v3  ;;  %v477_v17 = vld [vmem:[#allocation6] sm:$0xff]   ;;  %v482_v20 = vld [vmem:[#allocation8 + $0x30] ss:$8 sps:$4 sm:$0xff]   ;;  %335 = vmatprep.subr.bf16.mxu1 %v480_v19  ;;  %v486_v23 = vld [vmem:[#allocation8 + $0x14] ss:$8 sps:$4 sm:$0xff]   ;;  %p559_p4 = por %p558_p3, %p557_p2 }
  0x2e   :  { %434 = vmatprep.subr.bf16.mxu0 %v466_v4  ;;  %243 = vmatprep.mubr.bf16.mxu0 %v402_v12  ;;  %v483_v21 = vld [vmem:[#allocation8 + $0x24] ss:$8 sps:$4 sm:$0xff]   ;;  %v485_v22 = vld [vmem:[#allocation8 + $0x20] ss:$8 sps:$4 sm:$0xff]   ;;  %v488_v24 = vld [vmem:[#allocation8 + $0x10] ss:$8 sps:$4 sm:$0xff]  }
  0x2f   :  { %336 = vmatpush1.bf16.msra.mxu1 %v482_v20  ;;  %v489_v25 = vld [vmem:[#allocation8 + $0x4] ss:$8 sps:$4 sm:$0xff]   ;;  %v491_v26 = vld [vmem:[#allocation8] ss:$8 sps:$4 sm:$0xff]   ;;  %v400_v30 = vld [vmem:[%s671_s2] ss:$0 sm:$0xff]  ;;  %p560_p5 = pnand %p559_p4, %p553_p1 }
  0x30   :  { %337 = vmatprep.subr.bf16.mxu1 %v483_v21 }
  0x31   :  { %435 = vmatpush3.bf16.msra.mxu0 %v467_v5 }
  0x32   :  { %436 = vmatprep.subr.bf16.mxu0 %v468_v6 }
  0x33   :  { %338 = vmatpush1.bf16.msra.mxu1 %v485_v22 }
  0x34   :  { %339 = vmatprep.subr.bf16.mxu1 %v486_v23 }
  0x35   :  { %437 = vmatpush3.bf16.msra.mxu0 %v469_v7 }
  0x36   :  { %438 = vmatprep.subr.bf16.mxu0 %v470_v8 }
  0x37   :  { %340 = vmatpush1.bf16.msra.mxu1 %v488_v24 }
  0x38   :  { %341 = vmatprep.subr.bf16.mxu1 %v489_v25 }
  0x39   :  { %439 = vmatpush3.bf16.msra.mxu0 %v471_v9 }
  0x3a   :  { %440 = vmatprep.subr.bf16.mxu0 %v472_v10 }
  0x3b   :  { %342 = vmatpush1.bf16.msra.mxu1 %v491_v26 }
  0x3d   :  { %441 = vmatpush3.bf16.msra.mxu0 %v473_v13 }
  0x3e   :  { %442 = vmatprep.subr.bf16.mxu0 %v474_v14 }
  0x41   :  { %443 = vmatpush3.bf16.msra.mxu0 %v475_v15 }
  0x42   :  { %444 = vmatprep.subr.bf16.mxu0 %v476_v16 }
  0x45   :  { %445 = vmatpush3.bf16.msra.mxu0 %v477_v17 }
  0x48   :  { %244 = vmatmul.mubr.bf16.vlgmr.msra.gmra.mxu0 %v401_v18 }
 0x108   :  { %v446_v28 = vpop.f32.mrf.mxu0 }
 0x10a   :  { %v447_v29 = vpop.f32.mrf.mxu0 }
 0x10b   :  { %v448_v31 = vadd.f32 %v447_v29, %v446_v28 }
 0x10c   :  { %v449_v32 = vpop.f32.mrf.mxu0 }
 0x10d   :  { %v246_v33 = vadd.f32 %v448_v31, %v400_v30 }
 0x10e   :  { %v450_v34 = vpop.f32.mrf.mxu0 }
 0x10f   :  { %v429_v35 = vpack.c.bf16 %v246_v33, %v246_v33  ;;  %252 = vst.msk [vmem:[#allocation9] sm:$0xff] %vm251_vm0, %v246_v33 }
 0x111   :  { %257 = vrot.lane.b32.xlu0 %v429_v35, %s601_s24 }
 0x183   :  { %v258_v36 = vpop.permute.xlu0 %257 }
 0x184   :  { %261 = vst.msk [vmem:[#allocation2] sm:$0xf] %vm260_vm1, %v258_v36 }
 0x18b   :  { %v262_v37 = vld [vmem:[#allocation2] sm:$0xf] }
 0x18c   :  { %428 = vmatmul.mubr.msk.bf16.vlgmr.msra.gmra.mxu1 %vm251_vm0, %v262_v37 }
 0x18d   :  { %563 = shalt.err (!%p560_p5)
}
 0x18e   :  { %379 = dma.vmem_to_hbm [thread:$0]  %s377_s16, 128, %s674_s5, [#allocation5]   ;;  %v273_v38 = vlaneseq  ;;  %v271_v41 = vld [vmem:[%s673_s4] sm:$0x3] }
 0x18f   :  { %s609_s21 = smov [#allocation10]  }
 0x190   :  { %v274_v39 = vshrl.u32 %v273_v38, 7  ;;  %s386_s22 = sshll.u32 %s609_s21, 4  ;;  %s387_s22 = int_to_ptr.vmem [resolvable:$true] %s386_s22 }
 0x191   :  { %s572_s5 = scalar_lea.vmem %s387_s22, 256  ;;  %p577_p7 = scmp.lt.s32.totalorder %s387_s22, %s387_s22 }
 0x192   :  { %v275_v40 = vsub.s32 0, %v274_v39  ;;  %v279_v42 = vsub.s32 1, %v274_v39  ;;  %p573_p6 = scmp.ne.s32.totalorder %s387_s22, %s572_s5  ;;  %p578_p8 = scmp.lt.s32.totalorder %s572_s5, %s572_s5 }
 0x194   :  { %v276_v43 = vrot.slane %v271_v41, %v275_v40  ;;  %v280_v44 = vrot.slane %v271_v41, %v279_v42  ;;  %p579_p9 = por %p578_p8, %p577_p7 }
 0x196   :  { %p580_p10 = pnand %p579_p9, %p573_p6 }
 0x24c   :  { %v361_v45 = vpop.f32.mrf.mxu1 }
 0x24d   :  { %v362_v46 = vadd.f32 %v361_v45, %v276_v43 }
 0x24e   :  { %v363_v47 = vpop.f32.mrf.mxu1 }
 0x24f   :  { %368 = vst [vmem:[#allocation10] sm:$0xff] %v362_v46  ;;  %v364_v48 = vadd.f32 %v363_v47, %v280_v44 }
 0x250   :  { %v365_v49 = vpop.f32.mrf.mxu1 }
 0x251   :  { %369 = vst [vmem:[#allocation10 + $0x8] sm:$0xff] %v364_v48 }
 0x252   :  { %v366_v50 = vpop.f32.mrf.mxu1 }
 0x253   :  { %583 = shalt.err (!%p580_p10)
}
 0x254   :  { %389 = dma.vmem_to_hbm [thread:$0]  %s387_s22, 256, %s675_s6, [#allocation11]  }
 0x255   :  { %596 = dma.done.wait [#allocation5], 128  }
 0x256   :  { %597 = vsyncadd [#allocation5], 4294967168 }
 0x257   :  { %598 = dma.done.wait [#allocation11], 256  }
 0x258   :  { %599 = vsyncadd [#allocation11], 4294967040 }
 0x259   :  { %396 = vsyncpa [#allocation4], 1 }
 0x25a   :  { %397 = vsyncpa [#allocation7], 1 }
 0x25b   :  { %398 = vsyncpa [#allocation5], 1 }
 0x25c   :  { %399 = vsyncpa [#allocation11], 1 }

</bundles_post_ra>
